<compile_context>
chip_gen: v5e
topology: v5e:2x2
jax: 0.10.0
libtpu: 0.0.40
codegen_flags: <defaults>
</compile_context>

<pallas_src>
import functools

import jax
import jax.numpy as jnp
from jax import lax
from jax.experimental import pallas as pl
from jax.experimental.pallas import tpu as pltpu

_LANE = 128
_NEG_INF = -1e30  # finite "minus infinity" (avoids inf - inf NaNs)


def _round_up(x, m):
    return (x + m - 1) // m * m


def _padded_bytes(shape, dtype):
    """VMEM footprint of one buffer with (sublane, lane) tiling padding."""
    itemsize = jnp.dtype(dtype).itemsize
    dims = list(shape)
    if dims:
        dims[-1] = _round_up(dims[-1], _LANE)
    if len(dims) >= 2:
        dims[-2] = _round_up(dims[-2], max(8, 32 // itemsize))
    total = itemsize
    for d in dims:
        total *= d
    return total


def _is_v5_device():
    try:
        kind = jax.devices()[0].device_kind.lower()
    except Exception:
        return False
    return "v5" in kind


# --------------------------------------------------------------------------
# Kernel 1: fused QKV projection (one dot per sequence tile, per batch)
# --------------------------------------------------------------------------
def _qkv_proj_kernel(x_ref, w_ref, q_ref, k_ref, v_ref, *, dqk_p):
    """x_ref: (1, T, D); w_ref: (D, 2*dqk_p + dv_p) = [Wq*scale | Wk | Wv].

    q_ref/k_ref: (1, T, dqk_p); v_ref: (1, T, dv_p).  One MXU dot, then
    lane-aligned (multiple-of-128) slices of the result.
    """
    qkv = jnp.dot(x_ref[0], w_ref[...], preferred_element_type=jnp.float32)
    q_ref[0] = qkv[:, :dqk_p].astype(q_ref.dtype)
    k_ref[0] = qkv[:, dqk_p:2 * dqk_p].astype(k_ref.dtype)
    v_ref[0] = qkv[:, 2 * dqk_p:].astype(v_ref.dtype)


# --------------------------------------------------------------------------
# Kernel 2: flash attention over pre-projected Q / K / V tiles
# --------------------------------------------------------------------------
def _flash_attn_kernel(q_ref, k_ref, v_ref, o_ref, m_scr, l_scr, acc_scr,
                       *, seq_len, kv_tile, need_mask, exp_dtype, recip_approx):
    """One (batch, q_tile, kv_tile) grid step of online-softmax attention.

    q_ref: (1, TQ,  Dqk_pad)   k_ref: (1, TKV, Dqk_pad)   v_ref: (1, TKV, Dv_pad)
    o_ref: (1, TQ,  Dv_pad)
    scratch: m, l (TQ, 1) f32 | acc (TQ, Dv_pad) f32
    """
    kv_idx = pl.program_id(2)

    @pl.when(kv_idx == 0)
    def _init():
        m_scr[...] = jnp.full_like(m_scr, _NEG_INF)
        l_scr[...] = jnp.zeros_like(l_scr)
        acc_scr[...] = jnp.zeros_like(acc_scr)

    q = q_ref[0]
    k = k_ref[0]
    v = v_ref[0]

    # Scores: contract last dims directly on the MXU (no explicit transpose).
    s = lax.dot_general(q, k, (((1,), (1,)), ((), ())),
                        preferred_element_type=jnp.float32)       # (TQ, TKV) f32

    if need_mask:  # trace-time constant: only emitted when N was padded.
        # Padding is appended, so only the LAST kv tile can hold padded columns.
        def _mask(sv):
            col = kv_idx * kv_tile + lax.broadcasted_iota(jnp.int32, sv.shape, 1)
            return jnp.where(col < seq_len, sv, _NEG_INF)

        s = lax.cond(kv_idx == pl.num_programs(2) - 1, _mask, lambda sv: sv, s)

    # Online softmax update.
    m_prev = m_scr[...]
    m_new = jnp.maximum(m_prev, jnp.max(s, axis=-1, keepdims=True))
    alpha = jnp.exp(m_prev - m_new)                                # (TQ, 1) f32
    p = jnp.exp((s - m_new).astype(exp_dtype))                     # bf16 on v6e/v7x
    l_scr[...] = alpha * l_scr[...] + jnp.sum(
        p.astype(jnp.float32), axis=-1, keepdims=True)
    acc_scr[...] = alpha * acc_scr[...] + jnp.dot(
        p.astype(v.dtype), v, preferred_element_type=jnp.float32)
    m_scr[...] = m_new

    @pl.when(kv_idx == pl.num_programs(2) - 1)
    def _finalize():
        inv_l = pl.reciprocal(l_scr[...], approx=recip_approx)
        o_ref[0] = (acc_scr[...] * inv_l).astype(o_ref.dtype)


# --------------------------------------------------------------------------
# Wrapper
# --------------------------------------------------------------------------
def self_dot_product_attention(x, w_qkv, *, dim_single_qk, dim_single_v,
                               compute_dtype=jnp.bfloat16, seq_tile=None,
                               exp_in_bf16=None):
    """x: [B, N, D_token]; w_qkv: PyTorch Linear weight [2*Dqk+Dv, D_token]."""
    B, N, D = x.shape
    dim_single_head = 2 * dim_single_qk + dim_single_v
    assert w_qkv.shape == (dim_single_head, D)
    qk_scale = float(dim_single_qk) ** -0.5

    is_v5 = _is_v5_device()
    cd = jnp.dtype(compute_dtype)

    # Tile-size defaults: 256 fills the 2x256x256 MXU on v6e/v7x; 128 on v5e.
    if seq_tile is None:
        seq_tile = 128 if is_v5 else 256
    # bf16 packs 2 rows per sublane -> min sublane multiple 16; f32 -> 8.
    sub = 16 if cd.itemsize == 2 else 8
    seq_tile = _round_up(min(seq_tile, _round_up(N, sub)), sub)
    n_pad = _round_up(N, seq_tile)
    n_tiles = n_pad // seq_tile
    need_mask = (n_pad != N)

    # bf16 exponent only on bf16-capable EUPs (v6e / v7x), never on v5*.
    if exp_in_bf16 is None:
        exp_in_bf16 = (cd == jnp.dtype(jnp.bfloat16)) and not is_v5
    exp_dtype = jnp.bfloat16 if exp_in_bf16 else jnp.float32
    recip_approx = cd != jnp.dtype(jnp.float32)

    # Lane-dense (128-padded) head dims.
    dqk_p = _round_up(dim_single_qk, _LANE)
    dv_p = _round_up(dim_single_v, _LANE)
    dtot_p = 2 * dqk_p + dv_p

    # Build the fused [Wq*scale | Wk | Wv] slab (each block lane-padded to 128).
    w_t = jnp.transpose(w_qkv).astype(jnp.float32)                  # (D, H)
    wq = w_t[:, :dim_single_qk] * qk_scale
    wk = w_t[:, dim_single_qk:2 * dim_single_qk]
    wv = w_t[:, 2 * dim_single_qk:2 * dim_single_qk + dim_single_v]

    def _pad_cols(w, width):
        return jnp.pad(w, ((0, 0), (0, width - w.shape[1])))

    w_fused = jnp.concatenate(
        [_pad_cols(wq, dqk_p), _pad_cols(wk, dqk_p), _pad_cols(wv, dv_p)],
        axis=1).astype(compute_dtype)                               # (D, dtot_p)

    # Cast activations once, pad the sequence axis once.
    x_c = x.astype(compute_dtype)
    if need_mask:
        x_c = jnp.pad(x_c, ((0, 0), (0, n_pad - N), (0, 0)))

    # Explicit VMEM budget (double-buffered tiles + scratch), clamped to
    # [32 MiB, 64 MiB] so it stays honest even for v7x's 64 MiB VMEM.
    proj_vmem = 2 * (_padded_bytes((seq_tile, D), compute_dtype)
                     + _padded_bytes((D, dtot_p), compute_dtype)
                     + 2 * _padded_bytes((seq_tile, dqk_p), compute_dtype)
                     + _padded_bytes((seq_tile, dv_p), compute_dtype))
    flash_vmem = (2 * (2 * _padded_bytes((seq_tile, dqk_p), compute_dtype)
                       + _padded_bytes((seq_tile, dv_p), compute_dtype)
                       + _padded_bytes((seq_tile, dv_p), x.dtype))
                  + 2 * _padded_bytes((seq_tile, 1), jnp.float32)
                  + _padded_bytes((seq_tile, dv_p), jnp.float32))
    vmem_limit = int(min(max(2 * max(proj_vmem, flash_vmem) + (8 << 20),
                             32 << 20), 64 << 20))

    # ---- Pass 1: fused QKV projection (once per sequence tile) -------------
    proj_kernel = functools.partial(_qkv_proj_kernel, dqk_p=dqk_p)
    q_p, k_p, v_p = pl.pallas_call(
        proj_kernel,
        out_shape=(
            jax.ShapeDtypeStruct((B, n_pad, dqk_p), compute_dtype),
            jax.ShapeDtypeStruct((B, n_pad, dqk_p), compute_dtype),
            jax.ShapeDtypeStruct((B, n_pad, dv_p), compute_dtype),
        ),
        grid_spec=pltpu.PrefetchScalarGridSpec(
            num_scalar_prefetch=0,
            grid=(B, n_tiles),
            in_specs=[
                pl.BlockSpec((1, seq_tile, D), lambda b, ti: (b, ti, 0)),
                pl.BlockSpec((D, dtot_p), lambda b, ti: (0, 0)),
            ],
            out_specs=[
                pl.BlockSpec((1, seq_tile, dqk_p), lambda b, ti: (b, ti, 0)),
                pl.BlockSpec((1, seq_tile, dqk_p), lambda b, ti: (b, ti, 0)),
                pl.BlockSpec((1, seq_tile, dv_p), lambda b, ti: (b, ti, 0)),
            ],
        ),
        compiler_params=pltpu.CompilerParams(
            dimension_semantics=("parallel", "parallel"),
            vmem_limit_bytes=vmem_limit,
        ),
    )(x_c, w_fused)

    # ---- Pass 2: flash attention over projected Q / K / V ------------------
    flash_kernel = functools.partial(
        _flash_attn_kernel,
        seq_len=N,
        kv_tile=seq_tile,
        need_mask=need_mask,
        exp_dtype=exp_dtype,
        recip_approx=recip_approx,
    )
    out_padded = pl.pallas_call(
        flash_kernel,
        out_shape=jax.ShapeDtypeStruct((B, n_pad, dv_p), x.dtype),
        grid_spec=pltpu.PrefetchScalarGridSpec(
            num_scalar_prefetch=0,
            grid=(B, n_tiles, n_tiles),
            in_specs=[
                pl.BlockSpec((1, seq_tile, dqk_p), lambda b, qi, ki: (b, qi, 0)),
                pl.BlockSpec((1, seq_tile, dqk_p), lambda b, qi, ki: (b, ki, 0)),
                pl.BlockSpec((1, seq_tile, dv_p), lambda b, qi, ki: (b, ki, 0)),
            ],
            out_specs=pl.BlockSpec((1, seq_tile, dv_p),
                                   lambda b, qi, ki: (b, qi, 0)),
            scratch_shapes=[
                pltpu.VMEM((seq_tile, 1), jnp.float32),      # running max
                pltpu.VMEM((seq_tile, 1), jnp.float32),      # running sum
                pltpu.VMEM((seq_tile, dv_p), jnp.float32),   # f32 accumulator
            ],
        ),
        compiler_params=pltpu.CompilerParams(
            dimension_semantics=("parallel", "parallel", "arbitrary"),
            vmem_limit_bytes=vmem_limit,
        ),
    )(q_p, k_p, v_p)

    # Slice away sequence / lane padding (lane-dense store kept as default).
    return out_padded[:, :N, :dim_single_v]


def _reference(x, w_qkv, *, dim_single_qk, dim_single_v):
    """Plain-JAX replica of the PyTorch forward (num_heads=1, to_out=Identity)."""
    qk_scale = float(dim_single_qk) ** -0.5
    all_qkv = jnp.einsum("bnd,od->bno", x, w_qkv)
    q = all_qkv[:, :, :dim_single_qk]
    k = all_qkv[:, :, dim_single_qk:2 * dim_single_qk]
    v = all_qkv[:, :, 2 * dim_single_qk:2 * dim_single_qk + dim_single_v]
    s = jnp.einsum("bqd,bkd->bqk", q, k) * qk_scale
    p = jax.nn.softmax(s, axis=-1)
    return jnp.einsum("bqk,bkd->bqd", p, v)


if __name__ == "__main__":
    # Small shapes consistent with the module (num_heads=1, dim_out == dim_single_v).
    B, N = 2, 8
    dim_token = 32
    dim_single_qk = 16
    dim_single_v = 16
    dim_single_head = 2 * dim_single_qk + dim_single_v

    key = jax.random.PRNGKey(0)
    kx, kw = jax.random.split(key)
    x = jax.random.normal(kx, (B, N, dim_token), dtype=jnp.float32)
    bound = dim_token ** -0.5
    w_qkv = jax.random.uniform(
        kw, (dim_single_head, dim_token), dtype=jnp.float32,
        minval=-bound, maxval=bound,
    )

    ref = _reference(x, w_qkv, dim_single_qk=dim_single_qk,
                     dim_single_v=dim_single_v)

    # Default mixed-precision path (bf16 MXU operands, f32 accumulate).
    out_bf16 = self_dot_product_attention(
        x, w_qkv, dim_single_qk=dim_single_qk, dim_single_v=dim_single_v)
    out_bf16 = jax.block_until_ready(out_bf16)

    # Full-f32 path (semantic fidelity check, exact reciprocal).
    out_f32 = self_dot_product_attention(
        x, w_qkv, dim_single_qk=dim_single_qk, dim_single_v=dim_single_v,
        compute_dtype=jnp.float32)
    out_f32 = jax.block_until_ready(out_f32)

    assert out_bf16.shape == (B, N, dim_single_v)
    assert out_f32.shape == (B, N, dim_single_v)
    assert jnp.allclose(out_f32, ref, atol=2e-3, rtol=2e-3), "f32 mismatch vs reference"
    assert jnp.allclose(out_bf16, ref, atol=2e-2, rtol=2e-2), "bf16 mismatch vs reference"

    print("KERNEL_OK")
</pallas_src>

<mosaic_0001>
module attributes {stable_mosaic.version = 11 : i64} {
  func.func @_qkv_proj_kernel(%arg0: i32, %arg1: i32, %arg2: memref<1x16x32xbf16, #tpu.memory_space<vmem>>, %arg3: memref<32x384xbf16, #tpu.memory_space<vmem>>, %arg4: memref<1x16x128xbf16, #tpu.memory_space<vmem>>, %arg5: memref<1x16x128xbf16, #tpu.memory_space<vmem>>, %arg6: memref<1x16x128xbf16, #tpu.memory_space<vmem>>) attributes {dimension_semantics = [#tpu.dimension_semantics<parallel>, #tpu.dimension_semantics<parallel>], iteration_bounds = array<i64: 2, 1>, scalar_prefetch = 0 : i64, scratch_operands = 0 : i64, tpu.core_type = #tpu.core_type<tc>, window_params = [{transform_indices = @transform_0, window_bounds = array<i64: 1, 16, 32>}, {pipeline_mode = #tpu.pipeline_mode<synchronous>, transform_indices = @transform_1, window_bounds = array<i64: 32, 384>}, {transform_indices = @transform_2, window_bounds = array<i64: 1, 16, 128>}, {transform_indices = @transform_3, window_bounds = array<i64: 1, 16, 128>}, {transform_indices = @transform_4, window_bounds = array<i64: 1, 16, 128>}]} {
    %c0 = arith.constant 0 : index
    %c0_0 = arith.constant 0 : index
    %c0_1 = arith.constant 0 : index
    %0 = vector.load %arg2[%c0, %c0_0, %c0_1] : memref<1x16x32xbf16, #tpu.memory_space<vmem>>, vector<1x16x32xbf16>
    %1 = vector.shape_cast %0 : vector<1x16x32xbf16> to vector<16x32xbf16>
    %c0_2 = arith.constant 0 : index
    %c0_3 = arith.constant 0 : index
    %2 = vector.load %arg3[%c0_2, %c0_3] : memref<32x384xbf16, #tpu.memory_space<vmem>>, vector<32x384xbf16>
    %cst = arith.constant dense<0.000000e+00> : vector<16x384xf32>
    %3 = tpu.matmul %1, %2, %cst {dimension_numbers = #tpu.dot_dimension_numbers<[1], [0], [0], [1], [0, 0, 1, 1], [], []>} : vector<16x32xbf16>, vector<32x384xbf16>, vector<16x384xf32> -> vector<16x384xf32>
    %4 = vector.extract_strided_slice %3 {offsets = [0, 0], sizes = [16, 128], strides = [1, 1]} : vector<16x384xf32> to vector<16x128xf32>
    %5 = arith.truncf %4 : vector<16x128xf32> to vector<16x128xbf16>
    %c0_4 = arith.constant 0 : index
    %c0_5 = arith.constant 0 : index
    %c0_6 = arith.constant 0 : index
    %6 = vector.load %arg4[%c0_4, %c0_5, %c0_6] : memref<1x16x128xbf16, #tpu.memory_space<vmem>>, vector<1x16x128xbf16>
    %7 = vector.shape_cast %6 : vector<1x16x128xbf16> to vector<16x128xbf16>
    %8 = vector.shape_cast %5 : vector<16x128xbf16> to vector<1x16x128xbf16>
    tpu.vector_store %arg4[%c0_4, %c0_5, %c0_6], %8 {strides = array<i32>} : memref<1x16x128xbf16, #tpu.memory_space<vmem>>, vector<1x16x128xbf16>,
    %9 = vector.extract_strided_slice %3 {offsets = [0, 128], sizes = [16, 128], strides = [1, 1]} : vector<16x384xf32> to vector<16x128xf32>
    %10 = arith.truncf %9 : vector<16x128xf32> to vector<16x128xbf16>
    %c0_7 = arith.constant 0 : index
    %c0_8 = arith.constant 0 : index
    %c0_9 = arith.constant 0 : index
    %11 = vector.load %arg5[%c0_7, %c0_8, %c0_9] : memref<1x16x128xbf16, #tpu.memory_space<vmem>>, vector<1x16x128xbf16>
    %12 = vector.shape_cast %11 : vector<1x16x128xbf16> to vector<16x128xbf16>
    %13 = vector.shape_cast %10 : vector<16x128xbf16> to vector<1x16x128xbf16>
    tpu.vector_store %arg5[%c0_7, %c0_8, %c0_9], %13 {strides = array<i32>} : memref<1x16x128xbf16, #tpu.memory_space<vmem>>, vector<1x16x128xbf16>,
    %14 = vector.extract_strided_slice %3 {offsets = [0, 256], sizes = [16, 128], strides = [1, 1]} : vector<16x384xf32> to vector<16x128xf32>
    %15 = arith.truncf %14 : vector<16x128xf32> to vector<16x128xbf16>
    %c0_10 = arith.constant 0 : index
    %c0_11 = arith.constant 0 : index
    %c0_12 = arith.constant 0 : index
    %16 = vector.load %arg6[%c0_10, %c0_11, %c0_12] : memref<1x16x128xbf16, #tpu.memory_space<vmem>>, vector<1x16x128xbf16>
    %17 = vector.shape_cast %16 : vector<1x16x128xbf16> to vector<16x128xbf16>
    %18 = vector.shape_cast %15 : vector<16x128xbf16> to vector<1x16x128xbf16>
    tpu.vector_store %arg6[%c0_10, %c0_11, %c0_12], %18 {strides = array<i32>} : memref<1x16x128xbf16, #tpu.memory_space<vmem>>, vector<1x16x128xbf16>,
    return
  }
  func.func @transform_0(%arg0: i32, %arg1: i32) -> (i32, i32, i32) {
    %c0_i32 = arith.constant 0 : i32
    %c0_i32_0 = arith.constant 0 : i32
    return %arg0, %arg1, %c0_i32 : i32, i32, i32
  }
  func.func @transform_1(%arg0: i32, %arg1: i32) -> (i32, i32) {
    %c0_i32 = arith.constant 0 : i32
    %c0_i32_0 = arith.constant 0 : i32
    %c0_i32_1 = arith.constant 0 : i32
    return %c0_i32, %c0_i32_0 : i32, i32
  }
  func.func @transform_2(%arg0: i32, %arg1: i32) -> (i32, i32, i32) {
    %c0_i32 = arith.constant 0 : i32
    %c0_i32_0 = arith.constant 0 : i32
    return %arg0, %arg1, %c0_i32 : i32, i32, i32
  }
  func.func @transform_3(%arg0: i32, %arg1: i32) -> (i32, i32, i32) {
    %c0_i32 = arith.constant 0 : i32
    %c0_i32_0 = arith.constant 0 : i32
    return %arg0, %arg1, %c0_i32 : i32, i32, i32
  }
  func.func @transform_4(%arg0: i32, %arg1: i32) -> (i32, i32, i32) {
    %c0_i32 = arith.constant 0 : i32
    %c0_i32_0 = arith.constant 0 : i32
    return %arg0, %arg1, %c0_i32 : i32, i32, i32
  }
}

</mosaic_0001>

<bundles_post_ra>
// kernel: tpu_custom_call.1
= control target key start
LH: loop header
LB: loop body
LE: loop exit
PB: predicated region body
PF: predicated region fallthrough
CT: control target
= control target key end

     0   :  { %s1253_s0 = inlined_call_operand.hbm [shape: bf16[2,16,32], index: 0, kind: input, shape index: {}]   ;;  %s1254_s1 = inlined_call_operand.hbm [shape: bf16[32,384], index: 1, kind: input, shape index: {}]   ;;  %s1255_s2 = inlined_call_operand.hbm [shape: bf16[2,16,128], index: 2, kind: output, shape index: {0}]   ;;  %s1256_s3 = inlined_call_operand.hbm [shape: bf16[2,16,128], index: 3, kind: output, shape index: {1}]   ;;  %s1257_s4 = inlined_call_operand.hbm [shape: bf16[2,16,128], index: 4, kind: output, shape index: {2}]  }
   0x1   :  { %1261 = sst [smem:[#allocation16_spill]] %s1254_s1 }
   0x2   :  { %10 = vsyncpa [#allocation3], 0 }
   0x3   :  { %12 = vsyncpa [#allocation3 + $0x1], 0 }
   0x4   :  { %13 = vsyncpa [#allocation6], 0 }
   0x5   :  { %14 = vsyncpa [#allocation4], 0 }
   0x6   :  { %16 = vsyncpa [#allocation4 + $0x1], 0 }
   0x7   :  { %17 = vsyncpa [#allocation9], 0 }
   0x8   :  { %19 = vsyncpa [#allocation9 + $0x1], 0  ;;  %s1028_s15 = smov 0   ;;  %s1030_s16 = smov 0  }
   0x9   :  { %s1032_s17 = smov 0   ;;  %s1034_s18 = smov 0  }
   0xa   :  { %s1036_s19 = smov 0   ;;  %s1038_s20 = smov 0  }
   0xb LB: > { %s1059_s21 = sadd.s32 4294967295, %s994_s20   ;;  %s1258_s22 = sadd.s32 4294967294, %s994_s20   ;;  %s994_s20 = sphi %s1038_s20, %s25_s20   ;;  %s990_s19 = sphi %s1036_s19, %s1276_s19   ;;  %s986_s18 = sphi %s1034_s18, %s1275_s18   ;;  %s982_s17 = sphi %s1032_s17, %s1274_s17   ;;  %s978_s16 = sphi %s1030_s16, %s1273_s16   ;;  %s974_s15 = sphi %s1028_s15, %s1272_s15  }
   0xc   : > { %p59_p0 = scmp.ne.s32.totalorder %s978_s16, %s974_s15  ;;  %p60_p1 = scmp.eq.s32.totalorder %s1059_s21, 0 }
   0xd   : > { %p106_p2 = scmp.eq.s32.totalorder %s1059_s21, 1  ;;  %p112_p3 = scmp.eq.s32.totalorder %s1258_s22, 1 }
   0xe   : > { %p1070_p4 = por %p60_p1, %p59_p0  ;;  %p619_p5 = scmp.ge.s32.totalorder %s994_s20, 1 }
   0xf   : > { %p1075_p6 = por %p112_p3, %p59_p0  ;;  %p175_p7 = scmp.lt.s32.totalorder %s994_s20, 3 }
  0x10   : > { %s1264_s1 = sld [smem:[#allocation16_spill]]  ;;  %s996_s29 = smov [#allocation5]  }
  0x11   : > { %p1083_p8 = pnand %p619_p5, %p175_p7  ;;  %s188_s30 = sshll.u32 %s996_s29, 4  ;;  %s189_s30 = int_to_ptr.vmem [resolvable:$true] %s188_s30 }
  0x12   : > { %p621_p11 = scmp.ge.s32.totalorder %s994_s20, 2  ;;  %s997_s5 = smov 192  }
  0x13   : > { %p711_p9 = pneg %p1083_p8  ;;  %s998_s6 = smov 12  }
  0x14   : > { %s37_s7 = sadd.s32 1, %s990_s19  ;;  %s46_s8 = sadd.s32 1, %s982_s17 }
  0x15   : > { %p712_p10 = pnand %p711_p9, %p60_p1  ;;  %p39_p12 = scmp.ge.s32.totalorder %s37_s7, 2 }
  0x16   : > { %s186_s27 = sshll.u32 %s1264_s1, 4  ;;  %p53_p13 = scmp.ne.s32.totalorder %s982_s17, %s978_s16  ;;  %s187_s27 = int_to_ptr.hbm [resolvable:$true] %s186_s27 }
  0x17   : > { %714 = dma.hbm_to_vmem [thread:$0]  (!%p712_p10), %s187_s27, 768, %s189_s30, [#allocation6], %s997_s5, %s997_s5, %s998_s6  }
  0x18   : > { %p54_p0 = scmp.eq.s32.totalorder %s994_s20, 0  ;;  %s1278_s7 = smov (%p39_p12, %s37_s7), 0 }
  0x19   : > { %1266 = sst [smem:[#allocation15_spill]] %s1278_s7  ;;  %p1105_p5 = por %p106_p2, %p53_p13 }
  0x1a   : > { %p1099_p3 = por %p54_p0, %p53_p13  ;;  %s41_s11 = ssub.s32 %s990_s19, %s1278_s7 }
  0x1b   : > { %p730_p7 = scmp.lt.s32.totalorder %s994_s20, 2  ;;  %p44_p9 = scmp.eq.s32.totalorder %s41_s11, 0 }
  0x1c   : > { %s202_s12 = sand.u32 1, %s982_s17   ;;  %s673_s25 = sshll.u32 %s990_s19, 3 }
  0x1d   : > { %s622_s13 = sshll.u32 %s202_s12, 3  ;;  %s213_s29 = scalar_lea.hbm %s1253_s0, %s673_s25 }
  0x1e   : > { %s1114_s14 = scalar_select %p44_p9, %s982_s17, %s46_s8  }
  0x1f   : > { %s206_s30 = scalar_lea.vmem [#allocation2], %s622_s13  ;;  %s214_s6 = sshll.u32 %s213_s29, 4  ;;  %s215_s6 = int_to_ptr.hbm [resolvable:$true] %s214_s6 }
  0x20   : > { %s216_s5 = sshll.u32 %s206_s30, 4  ;;  %p716_p2 = pnand %p730_p7, %p1099_p3  ;;  %s217_s5 = int_to_ptr.vmem [resolvable:$true] %s216_s5 }
  0x21   : > { %s203_s22 = scalar_lea.sflag [#allocation3], %s202_s12  ;;  %s999_s1 = smov 64  }
  0x22   : > { %s1000_s7 = smov 4   ;;  %228 = sbr.rel (%p1083_p8) target bundleno = 222 (0xde), region = 28 }
  0x23   : > { %718 = dma.hbm_to_vmem [thread:$0]  (!%p716_p2), %s215_s6, 128, %s217_s5, %s203_s22, %s999_s1, %s999_s1, %s1000_s7  }
  0x24   : > { %s1125_s8 = sand.u32 (!%p1083_p8), 1, %s978_s16  }
  0x25   : > { %s1128_s11 = sshll.u32 (!%p1083_p8), %s1125_s8, 3  ;;  %s231_s13 = scalar_lea.sflag (!%p1083_p8), [#allocation3], %s1125_s8 }
  0x26   : > { %s234_s25 = scalar_lea.vmem (!%p1083_p8), [#allocation2], %s1128_s11 }
  0x27   : > { %957 = dma.done.wait (%p1070_p4), %s231_s13, 128  }
  0x28   : > { %959 = vsyncadd (%p1070_p4), %s231_s13, 4294967168 }
  0x29   : > { %961 = dma.done.wait (%p60_p1), [#allocation6], 768  }
  0x2a   : > { %963 = vsyncadd (%p60_p1), [#allocation6], 4294966528  ;;  %v649_v0 = vld [vmem:[#allocation5 + $0x18] sm:$0xf]  ;;  %v679_v1 = vld [vmem:[#allocation5 + $0x20] sm:$0xf0] }
  0x2b   : > { %v678_v2 = vld [vmem:[#allocation5 + $0x1c] sm:$0xf]  ;;  %v650_v3 = vor.u32 %v679_v1, %v649_v0  ;;  %v651_v4 = vld [vmem:[#allocation5 + $0x24] sm:$0xf0]  ;;  %v657_v5 = vld [vmem:[#allocation5 + $0x20] sm:$0xf] }
  0x2c   : > { %v680_v6 = vld [vmem:[#allocation5 + $0x28] sm:$0xf0]  ;;  %v654_v7 = vor.u32 %v678_v2, %v651_v4  ;;  %v637_v9 = vld [vmem:[#allocation5] sm:$0xf]  ;;  %v675_v11 = vld [vmem:[#allocation5 + $0x4] sm:$0xf] }
  0x2d   : > { %v658_v8 = vor.u32 %v680_v6, %v657_v5  ;;  %v676_v10 = vld [vmem:[#allocation5 + $0x8] sm:$0xf0]  ;;  %337 = vmatpush.bf16.msra.mxu0 %v650_v3  ;;  %v639_v13 = vld [vmem:[#allocation5 + $0xc] sm:$0xf0]  ;;  %v645_v14 = vld [vmem:[#allocation5 + $0x8] sm:$0xf] }
  0x2e   : > { %v638_v12 = vor.u32 %v676_v10, %v637_v9  ;;  %v677_v15 = vld [vmem:[#allocation5 + $0x10] sm:$0xf0]  ;;  %351 = vmatpush.bf16.msra.mxu1 %v654_v7  ;;  %v642_v16 = vor.u32 %v675_v11, %v639_v13  ;;  %vm327_vm0 = vcmask 261120   ;;  %s681_s1 = sshll.u32 %s986_s18, 3  ;;  %s260_s22 = scalar_lea.vmem [#allocation7], %s1128_s11 }
  0x2f   : > { %365 = vmatpush.bf16.msra.mxu2 %v658_v8  ;;  %v646_v17 = vor.u32 %v677_v15, %v645_v14  ;;  %v674_v18 = vld [vmem:[%s234_s25] sm:$0xff]  ;;  %s1142_s23 = sshll.u32 %s260_s22, 4  ;;  %s267_s28 = scalar_lea.vmem [#allocation8], %s1128_s11  ;;  %s411_s23 = int_to_ptr.vmem [resolvable:$true] %s1142_s23 }
  0x30   : > { %s1145_s7 = sshll.u32 %s267_s28, 4  ;;  %s428_s26 = scalar_lea.hbm %s1256_s3, %s681_s1  ;;  %s430_s7 = int_to_ptr.vmem [resolvable:$true] %s1145_s7 }
  0x31   : > { %338 = vmatpush.bf16.msra.mxu0 %v638_v12  ;;  %s390_s27 = sand.u32 1, %s1059_s21   ;;  %s409_s5 = scalar_lea.hbm %s1255_s2, %s681_s1 }
  0x32   : > { %352 = vmatpush.bf16.msra.mxu1 %v642_v16  ;;  %s1156_s18 = sshll.u32 %s428_s26, 4  ;;  %s1158_s6 = sshll.u32 %s409_s5, 4  ;;  %s432_s18 = int_to_ptr.hbm [resolvable:$true] %s1156_s18  ;;  %s413_s6 = int_to_ptr.hbm [resolvable:$true] %s1158_s6 }
  0x33   : > { %366 = vmatpush.bf16.msra.mxu2 %v646_v17  ;;  %s447_s25 = scalar_lea.hbm %s1257_s4, %s681_s1  ;;  %s1260_s9 = scalar_lea.vmem [#allocation10], %s1128_s11 }
  0x34   : > { %659 = vmatmul.msk.bf16.vlgmr.msra.gmra.mxu0 %vm327_vm0, %v674_v18  ;;  %s1168_s12 = sshll.u32 %s1260_s9, 4  ;;  %s1170_s26 = sshll.u32 %s447_s25, 4  ;;  %s449_s12 = int_to_ptr.vmem [resolvable:$true] %s1168_s12  ;;  %s451_s26 = int_to_ptr.hbm [resolvable:$true] %s1170_s26 }
  0x35   : > { %660 = vmatmul.msk.bf16.vlgmr.msra.gmra.mxu1 %vm327_vm0, %v674_v18  ;;  %s1172_s29 = scalar_lea.sflag [#allocation9], %s390_s27  ;;  %s862_s30 = sshra.s32 %s432_s18, 4  ;;  %s863_s30 = int_to_ptr.hbm [resolvable:$true] %s862_s30 }
  0x36   : > { %661 = vmatmul.msk.bf16.vlgmr.msra.gmra.mxu2 %vm327_vm0, %v674_v18  ;;  %s864_s5 = scalar_lea.hbm %s863_s30, 8  ;;  %p869_p10 = scmp.lt.s32.totalorder %s863_s30, %s1256_s3 }
  0x37   : > { %p865_p1 = scmp.ne.s32.totalorder %s863_s30, %s864_s5 }
  0x39   : > { %p866_p4 = pnand %p865_p1, %p1105_p5 }
  0x3b   : > { %p867_p8 = pneg %p866_p4 }
  0xb1   : > { %v340_v19 = vpop.f32.mrf.mxu0 }
  0xb2   : > { %v354_v20 = vpop.f32.mrf.mxu1 }
  0xb9   : > { %v368_v21 = vpop.f32.mrf.mxu2  ;;  %v342_v22 = vpop.f32.mrf.mxu0 }
  0xba   : > { %v687_v23 = vpack.c.bf16 %v342_v22, %v340_v19  ;;  %v356_v24 = vpop.f32.mrf.mxu1 }
  0xbb   : > { %v692_v25 = vpack.c.bf16 %v356_v24, %v354_v20 }
  0xbc   : > { %688 = vst [vmem:[%s260_s22] sm:$0xff] %v687_v23   ;;  %s868_s22 = scalar_lea.hbm %s1256_s3, 16 }
  0xbd   : > { %693 = vst [vmem:[%s267_s28] sm:$0xff] %v692_v25   ;;  %p870_p12 = scmp.lt.s32.totalorder %s868_s22, %s864_s5 }
  0xbf   : > { %p871_p13 = por %p870_p12, %p869_p10 }
  0xc1   : > { %p872_p0 = pnand %p871_p13, %p867_p8 }
  0xc3   : > { %875 = shalt.err (!%p872_p0)
}
  0xc4   : > { %s1001_s27 = smov 64   ;;  %s1002_s25 = smov 4  }
  0xc5   : > { %706 = dma.vmem_to_hbm [thread:$0]  (%p1105_p5), %s430_s7, 128, %s432_s18, %s1172_s29, %s1001_s27, %s1001_s27, %s1002_s25  }
  0xc6   : > { %s386_s1 = scalar_lea.sflag [#allocation4], %s1125_s8  ;;  %s890_s30 = sshra.s32 %s413_s6, 4  ;;  %s891_s30 = int_to_ptr.hbm [resolvable:$true] %s890_s30 }
  0xc7   : > { %s892_s5 = scalar_lea.hbm %s891_s30, 8  ;;  %s896_s28 = scalar_lea.hbm %s1255_s2, 16 }
  0xc8   : > { %p893_p3 = scmp.ne.s32.totalorder %s891_s30, %s892_s5  ;;  %p897_p2 = scmp.lt.s32.totalorder %s891_s30, %s1255_s2 }
  0xc9   : > { %p898_p1 = scmp.lt.s32.totalorder %s896_s28, %s892_s5 }
  0xca   : > { %p894_p7 = pnand %p893_p3, %p1105_p5 }
  0xcb   : > { %p899_p4 = por %p898_p1, %p897_p2 }
  0xcc   : > { %p895_p9 = pneg %p894_p7 }
  0xce   : > { %p900_p8 = pnand %p899_p4, %p895_p9 }
  0xd0   : > { %903 = shalt.err (!%p900_p8)
}
  0xd1   : > { %705 = dma.vmem_to_hbm [thread:$0]  (%p1105_p5), %s411_s23, 128, %s413_s6, %s386_s1, %s1001_s27, %s1001_s27, %s1002_s25   ;;  %v370_v26 = vpop.f32.mrf.mxu2 }
  0xd2   : > { %v697_v27 = vpack.c.bf16 %v370_v26, %v368_v21  ;;  %s1269_s8 = scalar_lea.vmem [#allocation10], %s1128_s11  ;;  %s918_s7 = sshra.s32 %s451_s26, 4  ;;  %s919_s7 = int_to_ptr.hbm [resolvable:$true] %s918_s7 }
  0xd3   : > { %s920_s18 = scalar_lea.hbm %s919_s7, 8  ;;  %s924_s5 = scalar_lea.hbm %s1257_s4, 16 }
  0xd4   : > { %698 = vst [vmem:[%s1269_s8] sm:$0xff] %v697_v27   ;;  %p921_p10 = scmp.ne.s32.totalorder %s919_s7, %s920_s18  ;;  %p925_p0 = scmp.lt.s32.totalorder %s919_s7, %s1257_s4 }
  0xd5   : > { %p926_p3 = scmp.lt.s32.totalorder %s924_s5, %s920_s18 }
  0xd6   : > { %p922_p12 = pnand %p921_p10, %p1105_p5 }
  0xd7   : > { %p927_p7 = por %p926_p3, %p925_p0 }
  0xd8   : > { %p923_p13 = pneg %p922_p12 }
  0xda   : > { %p928_p9 = pnand %p927_p7, %p923_p13 }
  0xdc   : > { %931 = shalt.err (!%p928_p9)
}
  0xdd   : > { %707 = dma.vmem_to_hbm [thread:$0]  (%p1105_p5), %s449_s12, 128, %s451_s26, %s1172_s29, %s1001_s27, %s1001_s27, %s1002_s25  }
  0xde PF: > { %s465_s11 = sand.u32 1, %s974_s15   ;;  %p720_p2 = pnand %p621_p11, %p1075_p6 }
  0xdf   : > { %s466_s23 = scalar_lea.sflag [#allocation4], %s465_s11 }
  0xe0   : > { %p721_p1 = pneg %p720_p2 }
  0xe2   : > { %965 = dma.done.wait (%p721_p1), %s466_s23, 128  }
  0xe3   : > { %967 = vsyncadd (%p721_p1), %s466_s23, 4294967168  ;;  %s1270_s6 = sadd.s32 4294967294, %s994_s20  }
  0xe4   : > { %s475_s10 = sand.u32 1, %s1270_s6  }
  0xe5   : > { %s476_s1 = scalar_lea.sflag [#allocation9], %s475_s10 }
  0xe6   : > { %969 = dma.done.wait (%p721_p1), %s476_s1, 256  }
  0xe7   : > { %971 = vsyncadd (%p721_p1), %s476_s1, 4294967040  ;;  %s25_s20 = sadd.s32 1, %s994_s20   ;;  %s1271_s24 = sld [smem:[#allocation15_spill]] }
  0xe8   : > { %p22_p5 = scmp.ge.s32.totalorder %s25_s20, 4   ;;  %s1272_s15 = smov %s978_s16 }
  0xe9   : > { %s1273_s16 = smov %s982_s17  ;;  %s1274_s17 = smov %s1114_s14 }
  0xea   : > { %s1275_s18 = smov %s990_s19  ;;  %24 = sbr.rel (!%p22_p5) target bundleno = 11 (0xb), region = 109 }
  0xed   : > { %s1276_s19 = smov %s1271_s24 }
  0xef   :  { %492 = vsyncpa [#allocation3], 1 }
  0xf0   :  { %494 = vsyncpa [#allocation3 + $0x1], 1 }
  0xf1   :  { %495 = vsyncpa [#allocation6], 1 }
  0xf2   :  { %496 = vsyncpa [#allocation4], 1 }
  0xf3   :  { %498 = vsyncpa [#allocation4 + $0x1], 1 }
  0xf4   :  { %499 = vsyncpa [#allocation9], 1 }
  0xf5   :  { %501 = vsyncpa [#allocation9 + $0x1], 1 }

</bundles_post_ra>
